<compile_context>
chip_gen: v6e
topology: v6e:2x2x1
jax: 0.10.0
libtpu: 0.0.40
codegen_flags: <defaults>
</compile_context>

<pallas_src>
import functools

import jax
import jax.numpy as jnp
from jax.experimental import pallas as pl
from jax.experimental.pallas import tpu as pltpu


def _ln_kernel(x_ref, alpha_ref, beta_ref, o_ref, *, epsilon):
    # x_ref: (1, C, tT); alpha_ref / beta_ref: (1, C, 1); o_ref: (1, C, tT)
    x = x_ref[...].astype(jnp.float32)
    mean = jnp.mean(x, axis=1, keepdims=True)           # (1, 1, tT)
    xc = x - mean                                       # centered, reused twice
    var = jnp.mean(xc * xc, axis=1, keepdims=True)      # (1, 1, tT)
    inv_std = jax.lax.rsqrt(var + epsilon)              # EUP rsqrt, no divide
    y = (xc * inv_std) * alpha_ref[...].astype(jnp.float32) \
        + beta_ref[...].astype(jnp.float32)
    o_ref[...] = y.astype(o_ref.dtype)                  # single lane-dense store


def _choose_tile_t(T, C, itemsize, max_tile_bytes=2 * 1024 * 1024):
    """Pick a T tile: multiple of 128 (or full T if T <= 128), VMEM-bounded."""
    if T <= 128:
        return T
    # Largest multiple of 128, capped at 2048 lanes and ~max_tile_bytes per
    # (1, C, tT) buffer so double-buffered in+out + f32 intermediates fit
    # comfortably under the scoped VMEM limit on every generation (incl. v7x).
    tt = (max_tile_bytes // (C * max(itemsize, 4))) // 128 * 128
    tt = max(128, min(2048, tt))
    return tt


def ln_pallas(x, alpha, beta, epsilon=1e-5):
    """x: [B, C, T]; alpha, beta: [1, C, 1]."""
    B, C, T = x.shape
    tT = _choose_tile_t(T, C, x.dtype.itemsize)
    grid = (B, pl.cdiv(T, tT))

    kernel = functools.partial(_ln_kernel, epsilon=epsilon)

    return pl.pallas_call(
        kernel,
        out_shape=jax.ShapeDtypeStruct((B, C, T), x.dtype),
        grid_spec=pltpu.PrefetchScalarGridSpec(
            num_scalar_prefetch=0,
            grid=grid,
            in_specs=[
                pl.BlockSpec((1, C, tT), lambda b, t: (b, 0, t)),
                pl.BlockSpec((1, C, 1), lambda b, t: (0, 0, 0)),
                pl.BlockSpec((1, C, 1), lambda b, t: (0, 0, 0)),
            ],
            out_specs=pl.BlockSpec((1, C, tT), lambda b, t: (b, 0, t)),
        ),
        compiler_params=pltpu.CompilerParams(
            # Both axes independent -> shard across v7x's two TensorCores.
            dimension_semantics=("parallel", "parallel"),
            # 32 MiB scoped VMEM: raises the v5e/v6e defaults for bigger tiles,
            # matches the v7x default (64 MiB physical) so it never overshoots.
            vmem_limit_bytes=32 * 1024 * 1024,
        ),
    )(x, alpha, beta)


def ln_reference(x, alpha, beta, epsilon=1e-5):
    mean = jnp.mean(x, axis=1, keepdims=True)
    var = jnp.mean((x - mean) ** 2, axis=1, keepdims=True)
    std = jnp.sqrt(var + epsilon)
    return (x - mean) / std * alpha + beta


if __name__ == "__main__":
    B, C, T = 2, 32, 16  # batch, channels (=dim), sequence length
    key = jax.random.PRNGKey(0)
    x = jax.random.normal(key, (B, C, T), dtype=jnp.float32)

    # Deterministic parameter init, matching LN.__init__:
    alpha = jnp.ones((1, C, 1), dtype=jnp.float32)
    beta = jnp.zeros((1, C, 1), dtype=jnp.float32)

    y = ln_pallas(x, alpha, beta)
    y = jax.block_until_ready(y)

    y_ref = ln_reference(x, alpha, beta)
    assert jnp.allclose(y, y_ref, atol=1e-5, rtol=1e-5), "mismatch vs reference"

    # Also exercise the tiled path (T > 128, non-multiple of 128 tail block).
    B2, C2, T2 = 2, 32, 640
    x2 = jax.random.normal(jax.random.PRNGKey(1), (B2, C2, T2), dtype=jnp.float32)
    a2 = jnp.ones((1, C2, 1), dtype=jnp.float32)
    b2 = jnp.zeros((1, C2, 1), dtype=jnp.float32)
    y2 = jax.block_until_ready(ln_pallas(x2, a2, b2))
    assert jnp.allclose(y2, ln_reference(x2, a2, b2), atol=1e-5, rtol=1e-5), \
        "mismatch vs reference (tiled path)"

    print("KERNEL_OK")
</pallas_src>

<mosaic_0001>
module attributes {stable_mosaic.version = 11 : i64} {
  func.func @_ln_kernel(%arg0: i32, %arg1: i32, %arg2: memref<1x32x16xf32, #tpu.memory_space<vmem>>, %arg3: memref<1x32x1xf32, #tpu.memory_space<vmem>>, %arg4: memref<1x32x1xf32, #tpu.memory_space<vmem>>, %arg5: memref<1x32x16xf32, #tpu.memory_space<vmem>>) attributes {dimension_semantics = [#tpu.dimension_semantics<parallel>, #tpu.dimension_semantics<parallel>], iteration_bounds = array<i64: 2, 1>, scalar_prefetch = 0 : i64, scratch_operands = 0 : i64, tpu.core_type = #tpu.core_type<tc>, window_params = [{transform_indices = @transform_0, window_bounds = array<i64: 1, 32, 16>}, {pipeline_mode = #tpu.pipeline_mode<synchronous>, transform_indices = @transform_1, window_bounds = array<i64: 1, 32, 1>}, {pipeline_mode = #tpu.pipeline_mode<synchronous>, transform_indices = @transform_2, window_bounds = array<i64: 1, 32, 1>}, {transform_indices = @transform_3, window_bounds = array<i64: 1, 32, 16>}]} {
    %c0 = arith.constant 0 : index
    %c0_0 = arith.constant 0 : index
    %c0_1 = arith.constant 0 : index
    %0 = vector.load %arg2[%c0, %c0_0, %c0_1] : memref<1x32x16xf32, #tpu.memory_space<vmem>>, vector<1x32x16xf32>
    %cst = arith.constant dense<0.000000e+00> : vector<1x16xf32>
    %1 = vector.multi_reduction <add>, %0, %cst [1] : vector<1x32x16xf32> to vector<1x16xf32>
    %2 = vector.shape_cast %1 : vector<1x16xf32> to vector<1x1x16xf32>
    %cst_2 = arith.constant 3.200000e+01 : f32
    %3 = vector.broadcast %cst_2 : f32 to vector<1x1x16xf32>
    %4 = arith.divf %2, %3 : vector<1x1x16xf32>
    %5 = vector.broadcast %4 : vector<1x1x16xf32> to vector<1x32x16xf32>
    %6 = arith.subf %0, %5 : vector<1x32x16xf32>
    %7 = arith.mulf %6, %6 : vector<1x32x16xf32>
    %cst_3 = arith.constant dense<0.000000e+00> : vector<1x16xf32>
    %8 = vector.multi_reduction <add>, %7, %cst_3 [1] : vector<1x32x16xf32> to vector<1x16xf32>
    %9 = vector.shape_cast %8 : vector<1x16xf32> to vector<1x1x16xf32>
    %cst_4 = arith.constant 3.200000e+01 : f32
    %10 = vector.broadcast %cst_4 : f32 to vector<1x1x16xf32>
    %11 = arith.divf %9, %10 : vector<1x1x16xf32>
    %cst_5 = arith.constant 9.99999974E-6 : f32
    %12 = vector.broadcast %cst_5 : f32 to vector<1x1x16xf32>
    %13 = arith.addf %11, %12 : vector<1x1x16xf32>
    %14 = math.rsqrt %13 : vector<1x1x16xf32>
    %15 = vector.broadcast %14 : vector<1x1x16xf32> to vector<1x32x16xf32>
    %16 = arith.mulf %6, %15 : vector<1x32x16xf32>
    %c0_6 = arith.constant 0 : index
    %c0_7 = arith.constant 0 : index
    %c0_8 = arith.constant 0 : index
    %17 = vector.load %arg3[%c0_6, %c0_7, %c0_8] : memref<1x32x1xf32, #tpu.memory_space<vmem>>, vector<1x32x1xf32>
    %18 = vector.broadcast %17 : vector<1x32x1xf32> to vector<1x32x16xf32>
    %19 = arith.mulf %16, %18 : vector<1x32x16xf32>
    %c0_9 = arith.constant 0 : index
    %c0_10 = arith.constant 0 : index
    %c0_11 = arith.constant 0 : index
    %20 = vector.load %arg4[%c0_9, %c0_10, %c0_11] : memref<1x32x1xf32, #tpu.memory_space<vmem>>, vector<1x32x1xf32>
    %21 = vector.broadcast %20 : vector<1x32x1xf32> to vector<1x32x16xf32>
    %22 = arith.addf %19, %21 : vector<1x32x16xf32>
    %c0_12 = arith.constant 0 : index
    %c0_13 = arith.constant 0 : index
    %c0_14 = arith.constant 0 : index
    %23 = vector.load %arg5[%c0_12, %c0_13, %c0_14] : memref<1x32x16xf32, #tpu.memory_space<vmem>>, vector<1x32x16xf32>
    tpu.vector_store %arg5[%c0_12, %c0_13, %c0_14], %22 {strides = array<i32>} : memref<1x32x16xf32, #tpu.memory_space<vmem>>, vector<1x32x16xf32>,
    return
  }
  func.func @transform_0(%arg0: i32, %arg1: i32) -> (i32, i32, i32) {
    %c0_i32 = arith.constant 0 : i32
    %c0_i32_0 = arith.constant 0 : i32
    return %arg0, %c0_i32, %arg1 : i32, i32, i32
  }
  func.func @transform_1(%arg0: i32, %arg1: i32) -> (i32, i32, i32) {
    %c0_i32 = arith.constant 0 : i32
    %c0_i32_0 = arith.constant 0 : i32
    %c0_i32_1 = arith.constant 0 : i32
    %c0_i32_2 = arith.constant 0 : i32
    return %c0_i32, %c0_i32_0, %c0_i32_1 : i32, i32, i32
  }
  func.func @transform_2(%arg0: i32, %arg1: i32) -> (i32, i32, i32) {
    %c0_i32 = arith.constant 0 : i32
    %c0_i32_0 = arith.constant 0 : i32
    %c0_i32_1 = arith.constant 0 : i32
    %c0_i32_2 = arith.constant 0 : i32
    return %c0_i32, %c0_i32_0, %c0_i32_1 : i32, i32, i32
  }
  func.func @transform_3(%arg0: i32, %arg1: i32) -> (i32, i32, i32) {
    %c0_i32 = arith.constant 0 : i32
    %c0_i32_0 = arith.constant 0 : i32
    return %arg0, %c0_i32, %arg1 : i32, i32, i32
  }
}

</mosaic_0001>

<bundles_post_ra>
// kernel: tpu_custom_call.1
= control target key start
LH: loop header
LB: loop body
LE: loop exit
PB: predicated region body
PF: predicated region fallthrough
CT: control target
= control target key end

     0   :  { %s480_s12 = smov 0   ;;  %s482_s13 = smov 0   ;;  %s556_s0 = inlined_call_operand.vmem [shape: f32[2,32,16], index: 0, kind: input, shape index: {}]   ;;  %s557_s1 = inlined_call_operand.vmem [shape: f32[1,32,1], index: 1, kind: input, shape index: {}]   ;;  %s558_s2 = inlined_call_operand.vmem [shape: f32[1,32,1], index: 2, kind: input, shape index: {}]   ;;  %s559_s3 = inlined_call_operand.vmem [shape: f32[2,32,16], index: 3, kind: output, shape index: {}]  }
   0x1   :  { %s484_s14 = smov 0  }
   0x2 LB: > { %s25_s15 = sadd.s32 1, %s453_s13  ;;  %p397_p0 = scmp.ge.s32.totalorder %s457_s14, 1  ;;  %s457_s14 = sphi %s484_s14, %s13_s14   ;;  %s453_s13 = sphi %s482_s13, %s561_s13   ;;  %s449_s12 = sphi %s480_s12, %s560_s12  }
   0x3   : > { %p27_p1 = scmp.ge.s32.totalorder %s25_s15, 2  ;;  %p156_p2 = scmp.lt.s32.totalorder %s457_s14, 3 }
   0x5   : > { %s563_s15 = smov (%p27_p1, %s25_s15), 0  ;;  %p157_p3 = pnand %p397_p0, %p156_p2 }
   0x6   : > { %p186_p4 = scmp.lt.s32.totalorder (!%p157_p3), %s449_s12, 1 }
   0x7   : > { %160 = sbr.rel (%p157_p3) target bundleno = 153 (0x99), region = 32 }
   0xc   : > { %v252_v0 = vld [vmem:[%s557_s1 + $0x10] sm:$0xff]  ;;  %v250_v1 = vld [vmem:[%s557_s1] sm:$0xff]  ;;  %v459_v2 = vmov 0   ;;  %s565_s12 = smov (!%p186_p4, %s449_s12), 1  ;;  %v253_v3 = vld [vmem:[%s557_s1 + $0x18] sm:$0xff]  ;;  %vm206_vm0 = vcmask 130048  }
   0xd   : > { %432 = vset.pattern.permute.xlu1 %v459_v2  ;;  %431 = vset.pattern.permute.xlu0 %v459_v2  ;;  %v251_v4 = vld [vmem:[%s557_s1 + $0x8] sm:$0xff]  ;;  %s404_s24 = sshll.u32 %s565_s12, 5  ;;  %v278_v6 = vld [vmem:[%s558_s2] sm:$0xff]  ;;  %v281_v7 = vld [vmem:[%s558_s2 + $0x18] sm:$0xff] }
   0xe   : > { %266 = vperm.xlu1 %432, %v252_v0   ;;  %256 = vperm.xlu0 %431, %v250_v1   ;;  %v279_v5 = vld [vmem:[%s558_s2 + $0x8] sm:$0xff]  ;;  %s193_s4 = scalar_lea.vmem %s556_s0, %s404_s24  ;;  %v280_v8 = vld [vmem:[%s558_s2 + $0x10] sm:$0xff]  ;;  %s201_s11 = scalar_lea.vmem %s559_s3, %s404_s24 }
   0xf   : > { %v202_v9 = vld [vmem:[%s193_s4] sm:$0xff]  ;;  %v203_v10 = vld [vmem:[%s193_s4 + $0x8] sm:$0xff]  ;;  %v204_v13 = vld [vmem:[%s193_s4 + $0x10] sm:$0xff] }
  0x10   : > { %v207_v11 = vsel %vm206_vm0, %v202_v9, 0.0  ;;  %v208_v12 = vsel %vm206_vm0, %v203_v10, 0.0  ;;  %v210_v15 = vsel %vm206_vm0, %v204_v13, 0.0  ;;  %v205_v16 = vld [vmem:[%s193_s4 + $0x18] sm:$0xff] }
  0x11   : > { %v209_v14 = vadd.f32 %v208_v12, %v207_v11  ;;  %v212_v18 = vsel %vm206_vm0, %v205_v16, 0.0 }
  0x12   : > { %271 = vperm.xlu1 %432, %v253_v3   ;;  %261 = vperm.xlu0 %431, %v251_v4  }
  0x13   : > { %v211_v17 = vadd.f32 %v210_v15, %v209_v14 }
  0x15   : > { %v213_v19 = vadd.f32 %v212_v18, %v211_v17 }
  0x16   : > { %289 = vperm.xlu1 %432, %v279_v5   ;;  %284 = vperm.xlu0 %431, %v278_v6  }
  0x17   : > { %v214_v20 = vrot.slane %v213_v19, 4 }
  0x19   : > { %v215_v21 = vadd.f32 %v214_v20, %v213_v19 }
  0x1a   : > { %299 = vperm.xlu1 %432, %v281_v7   ;;  %294 = vperm.xlu0 %431, %v280_v8  }
  0x1b   : > { %v216_v22 = vrot.slane %v215_v21, 2 }
  0x1d   : > { %v217_v23 = vadd.f32 %v216_v22, %v215_v21 }
  0x1f   : > { %v218_v24 = vrot.slane %v217_v23, 1 }
  0x21   : > { %v219_v25 = vadd.f32 %v218_v24, %v217_v23 }
  0x23   : > { %v221_v26 = vmul.f32 0.03125, %v219_v25 }
  0x25   : > { %v222_v27 = vsub.f32 %v202_v9, %v221_v26  ;;  %v223_v28 = vsub.f32 %v203_v10, %v221_v26  ;;  %v224_v29 = vsub.f32 %v204_v13, %v221_v26  ;;  %v225_v32 = vsub.f32 %v205_v16, %v221_v26 }
  0x27   : > { %v226_v30 = vmul.f32 %v222_v27, %v222_v27  ;;  %v227_v31 = vmul.f32 %v223_v28, %v223_v28  ;;  %v228_v33 = vmul.f32 %v224_v29, %v224_v29  ;;  %v229_v37 = vmul.f32 %v225_v32, %v225_v32 }
  0x29   : > { %v230_v34 = vsel %vm206_vm0, %v226_v30, 0.0  ;;  %v231_v35 = vsel %vm206_vm0, %v227_v31, 0.0  ;;  %v233_v38 = vsel %vm206_vm0, %v228_v33, 0.0  ;;  %v235_v40 = vsel %vm206_vm0, %v229_v37, 0.0 }
  0x2a   : > { %v232_v36 = vadd.f32 %v231_v35, %v230_v34 }
  0x2c   : > { %v234_v39 = vadd.f32 %v233_v38, %v232_v36 }
  0x2e   : > { %v236_v41 = vadd.f32 %v235_v40, %v234_v39 }
  0x30   : > { %v237_v42 = vrot.slane %v236_v41, 4 }
  0x32   : > { %v238_v43 = vadd.f32 %v237_v42, %v236_v41 }
  0x34   : > { %v239_v44 = vrot.slane %v238_v43, 2 }
  0x36   : > { %v240_v45 = vadd.f32 %v239_v44, %v238_v43 }
  0x38   : > { %v241_v46 = vrot.slane %v240_v45, 1 }
  0x3a   : > { %v242_v47 = vadd.f32 %v241_v46, %v240_v45 }
  0x3c   : > { %v243_v48 = vmul.f32 0.03125, %v242_v47 }
  0x3e   : > { %v244_v49 = vadd.f32 1e-05, %v243_v48 }
  0x40   : > { %433 = vrsqrt.f32 %v244_v49 }
  0x4d   : > { %v434_v50 = vpop.eup %433 }
  0x4e   : > { %v246_v53 = vmul.f32 %v434_v50, %v222_v27  ;;  %v247_v54 = vmul.f32 %v434_v50, %v223_v28  ;;  %v248_v57 = vmul.f32 %v434_v50, %v224_v29  ;;  %v249_v59 = vmul.f32 %v434_v50, %v225_v32 }
  0x89   : > { %v267_v51 = vpop.permute.xlu1 %266  ;;  %v257_v52 = vpop.permute.xlu0 %256 }
  0x8a   : > { %v274_v58 = vmul.f32 %v257_v52, %v246_v53  ;;  %v276_v1 = vmul.f32 %v267_v51, %v248_v57 }
  0x8d   : > { %v272_v55 = vpop.permute.xlu1 %271  ;;  %v262_v56 = vpop.permute.xlu0 %261 }
  0x8e   : > { %v275_v60 = vmul.f32 %v262_v56, %v247_v54  ;;  %v277_v2 = vmul.f32 %v272_v55, %v249_v59 }
  0x91   : > { %v290_v61 = vpop.permute.xlu1 %289  ;;  %v285_v62 = vpop.permute.xlu0 %284 }
  0x92   : > { %v303_v63 = vadd.f32 %v290_v61, %v275_v60  ;;  %v302_v0 = vadd.f32 %v285_v62, %v274_v58 }
  0x94   : > { %307 = vst.msk [vmem:[%s201_s11 + $0x8] sm:$0xff] %vm206_vm0, %v303_v63  ;;  %306 = vst.msk [vmem:[%s201_s11] sm:$0xff] %vm206_vm0, %v302_v0 }
  0x95   : > { %v300_v3 = vpop.permute.xlu1 %299  ;;  %v295_v4 = vpop.permute.xlu0 %294 }
  0x96   : > { %v305_v5 = vadd.f32 %v300_v3, %v277_v2  ;;  %v304_v6 = vadd.f32 %v295_v4, %v276_v1 }
  0x98   : > { %309 = vst.msk [vmem:[%s201_s11 + $0x18] sm:$0xff] %vm206_vm0, %v305_v5  ;;  %308 = vst.msk [vmem:[%s201_s11 + $0x10] sm:$0xff] %vm206_vm0, %v304_v6 }
  0x99 PF: > { %s13_s14 = sadd.s32 1, %s457_s14   ;;  %s560_s12 = smov %s453_s13 }
  0x9a   : > { %p10_p5 = scmp.ge.s32.totalorder %s13_s14, 4   ;;  %s561_s13 = smov %s563_s15 }
  0x9c   :  { %12 = sbr.rel (!%p10_p5) target bundleno = 2 (0x2), region = 62 }

</bundles_post_ra>
